<compile_context>
chip_gen: v7x
topology: tpu7x:2x2x1
jax: 0.10.0
libtpu: 0.0.40
codegen_flags: <defaults>
</compile_context>

<pallas_src>
import functools

import numpy as np
import jax
import jax.numpy as jnp
from jax.experimental import pallas as pl
from jax.experimental.pallas import tpu as pltpu


def make_positional_encodings(sequence_length, decoder_model, dtype=jnp.float32):
    """Exactly reproduces the buffer built in PositionalEncodings.__init__
    (cos on even dims, sin on odd dims, raw dim index in the exponent --
    matches the PyTorch module as written)."""
    tok = np.arange(sequence_length, dtype=np.float32).reshape(-1, 1)
    dim = np.arange(decoder_model, dtype=np.float32).reshape(1, -1)
    angles = tok / np.power(10000.0, 2.0 * dim / decoder_model)
    enc = np.zeros((1, sequence_length, decoder_model), dtype=np.float32)
    enc[0, :, 0::2] = np.cos(angles[:, 0::2])
    enc[0, :, 1::2] = np.sin(angles[:, 1::2])
    return jnp.asarray(enc, dtype=dtype)


def _pe_dropout_kernel(seed_ref, x_ref, pe_ref, o_ref, *, dropout_p, n_cols):
    """y = dropout(x + pe) on a (tr, tc) tile of the flattened (B, S*D) slab."""
    # Do the math in f32 (safe on v5e where the VPU has no bf16), cast on store.
    y = x_ref[...].astype(jnp.float32) + pe_ref[...].astype(jnp.float32)

    if dropout_p > 0.0:                       # static Python branch (train mode)
        tr, tc = x_ref.shape
        r0 = pl.program_id(0) * tr
        c0 = pl.program_id(1) * tc
        rows = jax.lax.broadcasted_iota(jnp.int32, (tr, tc), 0) + r0
        cols = jax.lax.broadcasted_iota(jnp.int32, (tr, tc), 1) + c0
        # Absolute element index -> stateless counter-based hash (lowbias32).
        idx = (rows * n_cols + cols).astype(jnp.uint32)
        seed_u = seed_ref[0].astype(jnp.uint32)
        h = idx ^ (seed_u * jnp.uint32(0x9E3779B9))
        h = (h ^ (h >> 16)) * jnp.uint32(0x7FEB352D)
        h = (h ^ (h >> 15)) * jnp.uint32(0x846CA68B)
        h = h ^ (h >> 16)
        # 23 uniform bits -> signed compare (no unsigned-compare lowering needed).
        r = (h & jnp.uint32(0x7FFFFF)).astype(jnp.int32)
        thresh = jnp.int32(int(dropout_p * float(1 << 23)))
        keep = r >= thresh                     # P(keep) = 1 - dropout_p
        scale = jnp.float32(1.0 / (1.0 - dropout_p))
        y = y * jnp.where(keep, scale, jnp.float32(0.0))

    o_ref[...] = y.astype(o_ref.dtype)


def _pick_col_tile(C, bytes_per, target_bytes):
    """Largest multiple-of-128 divisor of C with row-bytes <= target, else C."""
    if C % 128 != 0:
        return C                               # must use full dim (lane rule)
    max_tc = max(128, (target_bytes // bytes_per) // 128 * 128)
    if C <= max_tc:
        return C
    best, t = 128, 128
    while t <= max_tc:
        if C % t == 0:
            best = t
        t += 128
    return best


def _pick_row_tile(B, desired):
    """Largest multiple-of-8 divisor of B that is <= desired, else B."""
    if desired >= B:
        return B
    best, t = None, 8
    while t <= desired:
        if B % t == 0:
            best = t
        t += 8
    return best if best is not None else B


def positional_encodings_forward(x, pe, seed, *, dropout_p, training=True):
    """x: (B, S, D); pe: (1, S, D); seed: int32[1]."""
    B, S, D = x.shape
    p = float(dropout_p) if training else 0.0

    if p <= 0.0:
        # Eval mode / p == 0: plain JAX so XLA fuses the add into neighbours.
        return x + pe
    if p >= 1.0:
        return jnp.zeros_like(x)

    # Lane-dense flattening: the PE row is identical for every batch element.
    C = S * D
    x2 = x.reshape(B, C)
    pe2 = pe.reshape(1, C)

    bytes_per = x.dtype.itemsize
    target = 2 * 1024 * 1024                   # ~2 MiB per x tile: amortizes the
    tc = _pick_col_tile(C, bytes_per, target)  # ~0.35us/step overhead yet keeps
    tr = _pick_row_tile(B, max(1, target // (tc * bytes_per)))  # <16 MiB live
    grid = (B // tr, C // tc)

    seed = jnp.asarray(seed, dtype=jnp.int32).reshape(-1)
    kernel = functools.partial(_pe_dropout_kernel, dropout_p=p, n_cols=C)

    out = pl.pallas_call(
        kernel,
        out_shape=jax.ShapeDtypeStruct((B, C), x.dtype),
        grid_spec=pltpu.PrefetchScalarGridSpec(
            num_scalar_prefetch=1,
            grid=grid,
            in_specs=[
                pl.BlockSpec((tr, tc), lambda i, j, seed_ref: (i, j)),  # x rows
                pl.BlockSpec((1, tc), lambda i, j, seed_ref: (0, j)),   # pe tile
            ],
            out_specs=pl.BlockSpec((tr, tc), lambda i, j, seed_ref: (i, j)),
        ),
        compiler_params=pltpu.CompilerParams(
            dimension_semantics=("parallel", "parallel"),  # v7x: shard over 2 TCs
            vmem_limit_bytes=32 * 1024 * 1024,             # raise v5e's 16 MiB default
        ),
    )(seed, x2, pe2)
    return out.reshape(B, S, D)


# TODO(synk): the rest of CaptionDecoder (embedding lookup, entry linears,
# ResidualBlock, nn.TransformerDecoder stack, classifier) is not translated
# here; this kernel covers the PositionalEncodings add+dropout hot path.


if __name__ == "__main__":
    B, S, D = 2, 8, 32            # batch, sequence_length, decoder_model
    dropout_p = 0.1

    key = jax.random.PRNGKey(0)
    x = jax.random.normal(key, (B, S, D), dtype=jnp.float32)
    pe = make_positional_encodings(S, D)
    seed = jnp.array([0], dtype=jnp.int32)

    ref = x + pe

    # Eval mode (dropout = identity): plain-JAX fast path, exact match.
    y_eval = jax.block_until_ready(
        positional_encodings_forward(x, pe, seed, dropout_p=dropout_p, training=False))
    assert y_eval.shape == (B, S, D) and y_eval.dtype == jnp.float32
    assert jnp.allclose(y_eval, ref, atol=1e-6), "eval-mode mismatch"

    # Train mode: Pallas kernel with in-kernel stateless hash dropout.
    # Every element must be either 0 (dropped) or ref/(1-p) (kept & rescaled).
    y_train = jax.block_until_ready(
        positional_encodings_forward(x, pe, seed, dropout_p=dropout_p, training=True))
    scaled = ref / (1.0 - dropout_p)
    ok = jnp.all(jnp.isclose(y_train, 0.0, atol=1e-6)
                 | jnp.isclose(y_train, scaled, atol=1e-5, rtol=1e-5))
    assert bool(ok), "train-mode dropout mismatch"

    # Loose sanity: the dropout mask is neither all-keep nor all-drop.
    big = jnp.abs(scaled) > 1e-3
    kept = jnp.isclose(y_train, scaled, atol=1e-5, rtol=1e-5) & big
    frac = float(jnp.sum(kept) / jnp.maximum(jnp.sum(big), 1))
    assert 0.5 < frac < 1.0, f"dropout keep fraction looks wrong: {frac}"

    print("KERNEL_OK")
</pallas_src>

<mosaic_0001>
module attributes {stable_mosaic.version = 11 : i64} {
  func.func @_pe_dropout_kernel(%arg0: i32, %arg1: i32, %arg2: memref<1xi32, #tpu.memory_space<smem>>, %arg3: memref<2x256xf32, #tpu.memory_space<vmem>>, %arg4: memref<1x256xf32, #tpu.memory_space<vmem>>, %arg5: memref<2x256xf32, #tpu.memory_space<vmem>>) attributes {dimension_semantics = [#tpu.dimension_semantics<parallel>, #tpu.dimension_semantics<parallel>], iteration_bounds = array<i64: 1, 1>, scalar_prefetch = 1 : i64, scratch_operands = 0 : i64, tpu.core_type = #tpu.core_type<tc>, window_params = [{transform_indices = @transform_0, window_bounds = array<i64: 2, 256>}, {transform_indices = @transform_1, window_bounds = array<i64: 1, 256>}, {transform_indices = @transform_2, window_bounds = array<i64: 2, 256>}]} {
    %c0 = arith.constant 0 : index
    %c0_0 = arith.constant 0 : index
    %0 = vector.load %arg3[%c0, %c0_0] : memref<2x256xf32, #tpu.memory_space<vmem>>, vector<2x256xf32>
    %c0_1 = arith.constant 0 : index
    %c0_2 = arith.constant 0 : index
    %1 = vector.load %arg4[%c0_1, %c0_2] : memref<1x256xf32, #tpu.memory_space<vmem>>, vector<1x256xf32>
    %2 = vector.broadcast %1 : vector<1x256xf32> to vector<2x256xf32>
    %3 = arith.addf %0, %2 : vector<2x256xf32>
    %c2_i32 = arith.constant 2 : i32
    %4 = arith.muli %arg0, %c2_i32 : i32
    %c256_i32 = arith.constant 256 : i32
    %5 = arith.muli %arg1, %c256_i32 : i32
    %6 = tpu.iota {dimensions = array<i32: 0>} : vector<2x256xi32>
    %7 = vector.broadcast %4 : i32 to vector<2x256xi32>
    %8 = arith.addi %6, %7 : vector<2x256xi32>
    %9 = tpu.iota {dimensions = array<i32: 1>} : vector<2x256xi32>
    %10 = vector.broadcast %5 : i32 to vector<2x256xi32>
    %11 = arith.addi %9, %10 : vector<2x256xi32>
    %c256_i32_3 = arith.constant 256 : i32
    %12 = vector.broadcast %c256_i32_3 : i32 to vector<2x256xi32>
    %13 = arith.muli %8, %12 : vector<2x256xi32>
    %14 = arith.addi %13, %11 : vector<2x256xi32>
    %c0_4 = arith.constant 0 : index
    %15 = memref.load %arg2[%c0_4] : memref<1xi32, #tpu.memory_space<smem>>
    %c-1640531527_i32 = arith.constant -1640531527 : i32
    %16 = arith.muli %15, %c-1640531527_i32 : i32
    %17 = vector.broadcast %16 : i32 to vector<2x256xi32>
    %18 = arith.xori %14, %17 : vector<2x256xi32>
    %c16_i32 = arith.constant 16 : i32
    %19 = vector.broadcast %c16_i32 : i32 to vector<2x256xi32>
    %20 = arith.shrui %18, %19 : vector<2x256xi32>
    %21 = arith.xori %18, %20 : vector<2x256xi32>
    %c2146121005_i32 = arith.constant 2146121005 : i32
    %22 = vector.broadcast %c2146121005_i32 : i32 to vector<2x256xi32>
    %23 = arith.muli %21, %22 : vector<2x256xi32>
    %c15_i32 = arith.constant 15 : i32
    %24 = vector.broadcast %c15_i32 : i32 to vector<2x256xi32>
    %25 = arith.shrui %23, %24 : vector<2x256xi32>
    %26 = arith.xori %23, %25 : vector<2x256xi32>
    %c-2073254261_i32 = arith.constant -2073254261 : i32
    %27 = vector.broadcast %c-2073254261_i32 : i32 to vector<2x256xi32>
    %28 = arith.muli %26, %27 : vector<2x256xi32>
    %c16_i32_5 = arith.constant 16 : i32
    %29 = vector.broadcast %c16_i32_5 : i32 to vector<2x256xi32>
    %30 = arith.shrui %28, %29 : vector<2x256xi32>
    %31 = arith.xori %28, %30 : vector<2x256xi32>
    %c8388607_i32 = arith.constant 8388607 : i32
    %32 = vector.broadcast %c8388607_i32 : i32 to vector<2x256xi32>
    %33 = arith.andi %31, %32 : vector<2x256xi32>
    %c838860_i32 = arith.constant 838860 : i32
    %34 = vector.broadcast %c838860_i32 : i32 to vector<2x256xi32>
    %35 = arith.cmpi sge, %33, %34 : vector<2x256xi32>
    %cst = arith.constant 1.11111116 : f32
    %cst_6 = arith.constant 0.000000e+00 : f32
    %36 = vector.broadcast %cst : f32 to vector<2x256xf32>
    %37 = vector.broadcast %cst_6 : f32 to vector<2x256xf32>
    %38 = arith.select %35, %36, %37 : vector<2x256xi1>, vector<2x256xf32>
    %39 = arith.mulf %3, %38 : vector<2x256xf32>
    %c0_7 = arith.constant 0 : index
    %c0_8 = arith.constant 0 : index
    %40 = vector.load %arg5[%c0_7, %c0_8] : memref<2x256xf32, #tpu.memory_space<vmem>>, vector<2x256xf32>
    tpu.vector_store %arg5[%c0_7, %c0_8], %39 {strides = array<i32>} : memref<2x256xf32, #tpu.memory_space<vmem>>, vector<2x256xf32>,
    return
  }
  func.func @transform_0(%arg0: i32, %arg1: i32, %arg2: memref<1xi32, #tpu.memory_space<smem>>) -> (i32, i32) {
    %c0_i32 = arith.constant 0 : i32
    return %arg0, %arg1 : i32, i32
  }
  func.func @transform_1(%arg0: i32, %arg1: i32, %arg2: memref<1xi32, #tpu.memory_space<smem>>) -> (i32, i32) {
    %c0_i32 = arith.constant 0 : i32
    %c0_i32_0 = arith.constant 0 : i32
    return %c0_i32, %arg1 : i32, i32
  }
  func.func @transform_2(%arg0: i32, %arg1: i32, %arg2: memref<1xi32, #tpu.memory_space<smem>>) -> (i32, i32) {
    %c0_i32 = arith.constant 0 : i32
    return %arg0, %arg1 : i32, i32
  }
}

</mosaic_0001>

<bundles_post_ra>
// kernel: tpu_custom_call.1
= control target key start
LH: loop header
LB: loop body
LE: loop exit
PB: predicated region body
PF: predicated region fallthrough
CT: control target
= control target key end

     0   :  { %9 = vsyncpa [#allocation5], 0  ;;  %s223_s0 = inlined_call_operand.<no memory space> [shape: s32[1], index: 0, kind: input, shape index: {}]   ;;  %s224_s1 = inlined_call_operand.hbm [shape: f32[2,256], index: 1, kind: input, shape index: {}]   ;;  %s225_s2 = inlined_call_operand.vmem [shape: f32[1,256], index: 2, kind: input, shape index: {}]   ;;  %s226_s3 = inlined_call_operand.hbm [shape: f32[2,256], index: 3, kind: output, shape index: {}]  }
   0x1   :  { %10 = vsyncpa [#allocation6], 0  ;;  %s169_s12 = smov [#allocation4]   ;;  %s121_s16 = scalar_lea.hbm %s224_s1, 64 }
   0x2   :  { %s17_s13 = sshll.u32 %s169_s12, 4  ;;  %p122_p0 = scmp.ne.s32.totalorder %s224_s1, %s121_s16  ;;  %s18_s13 = int_to_ptr.vmem [resolvable:$true] %s17_s13 }
   0x3   :  { %p125_p1 = scmp.lt.u32.totalorder %s121_s16, %s224_s1 }
   0x5   :  { %p127_p2 = pnand %p125_p1, %p122_p0 }
   0x7   :  { %130 = shalt.err (!%p127_p2)
}
   0x8   :  { %s131_s21 = scalar_lea.vmem %s18_s13, 64  ;;  %p136_p4 = scmp.lt.s32.totalorder %s18_s13, %s18_s13 }
   0x9   :  { %p132_p3 = scmp.ne.s32.totalorder %s18_s13, %s131_s21  ;;  %p137_p5 = scmp.lt.s32.totalorder %s131_s21, %s131_s21 }
   0xb   :  { %p138_p6 = por %p137_p5, %p136_p4 }
   0xd   :  { %p139_p7 = pnand %p138_p6, %p132_p3 }
   0xf   :  { %142 = shalt.err (!%p139_p7)
}
  0x10   :  { %20 = dma.hbm_to_vmem [thread:$0]  %s224_s1, 64, %s18_s13, [#allocation5]  }
  0x11   :  { %165 = dma.done.wait [#allocation5], 64  }
  0x12   :  { %166 = vsyncadd [#allocation5], 4294967232  ;;  %v29_v0 = vlaneseq  ;;  %s63_s26 = smul.u32 2654435769, %s223_s0  ;;  %v170_v14 = vmov 1983009808  }
  0x13   :  { %v39_v15 = vunpack.c.l.s4 %v170_v14  ;;  %v27_v20 = vld [vmem:[%s225_s2] sm:$0x3]  ;;  %v171_v40 = vmov 0.0   ;;  %s172_s2 = smov [#allocation7]  }
  0x14   :  { %v30_v1 = vshrl.u32 %v29_v0, 7  ;;  %v54_v2 = vand.u32 127, %v29_v0  ;;  %v64_v5 = vstv %s63_s26  ;;  %v26_v39 = vld [vmem:[#allocation4] sm:$0xf]  ;;  %s108_s27 = sshll.u32 %s172_s2, 4  ;;  %s109_s27 = int_to_ptr.vmem [resolvable:$true] %s108_s27 }
  0x15   :  { %v40_v23 = vunpack.c.0.s8 %v39_v15  ;;  %s143_s28 = scalar_lea.vmem %s109_s27, 64  ;;  %p148_p9 = scmp.lt.s32.totalorder %s109_s27, %s109_s27 }
  0x16   :  { %v55_v3 = vadd.s32 128, %v54_v2  ;;  %v59_v4 = vmul.u32 256, %v30_v1  ;;  %v31_v16 = vsub.s32 0, %v30_v1  ;;  %v35_v17 = vsub.s32 1, %v30_v1  ;;  %p144_p8 = scmp.ne.s32.totalorder %s109_s27, %s143_s28  ;;  %p149_p10 = scmp.lt.s32.totalorder %s143_s28, %s143_s28 }
  0x17   :  { %v43_v31 = vsub.s32 %v40_v23, %v30_v1 }
  0x18   :  { %v60_v6 = vadd.s32 %v59_v4, %v54_v2  ;;  %v61_v7 = vadd.s32 %v59_v4, %v55_v3  ;;  %v32_v24 = vrot.slane %v27_v20, %v31_v16  ;;  %v36_v25 = vrot.slane %v27_v20, %v35_v17  ;;  %p150_p11 = por %p149_p10, %p148_p9 }
  0x1a   :  { %v65_v8 = vxor.u32 %v64_v5, %v60_v6  ;;  %v66_v9 = vxor.u32 %v64_v5, %v61_v7  ;;  %v37_v30 = vcombine.low %v32_v24, %v36_v25  ;;  %p151_p12 = pnand %p150_p11, %p144_p8 }
  0x1c   :  { %v67_v10 = vshrl.u32 %v65_v8, 16  ;;  %v68_v11 = vshrl.u32 %v66_v9, 16  ;;  %v44_v36 = vrot.slane %v37_v30, %v43_v31 }
  0x1e   :  { %v69_v12 = vxor.u32 %v67_v10, %v65_v8  ;;  %v70_v13 = vxor.u32 %v68_v11, %v66_v9  ;;  %v46_v43 = vadd.f32 %v44_v36, %v26_v39 }
  0x20   :  { %v71_v18 = vmul.u32 2146121005, %v69_v12  ;;  %v72_v19 = vmul.u32 2146121005, %v70_v13 }
  0x22   :  { %v73_v21 = vshrl.u32 %v71_v18, 15  ;;  %v74_v22 = vshrl.u32 %v72_v19, 15 }
  0x24   :  { %v75_v26 = vxor.u32 %v73_v21, %v71_v18  ;;  %v76_v27 = vxor.u32 %v74_v22, %v72_v19 }
  0x26   :  { %v77_v28 = vmul.u32 2221713035, %v75_v26  ;;  %v78_v29 = vmul.u32 2221713035, %v76_v27 }
  0x28   :  { %v79_v32 = vshrl.u32 %v77_v28, 16  ;;  %v80_v33 = vshrl.u32 %v78_v29, 16 }
  0x2a   :  { %v81_v34 = vxor.u32 %v79_v32, %v77_v28  ;;  %v82_v35 = vxor.u32 %v80_v33, %v78_v29 }
  0x2c   :  { %v83_v37 = vand.u32 8388607, %v81_v34  ;;  %v84_v38 = vand.u32 8388607, %v82_v35 }
  0x2e   :  { %vm85_vm0 = vcmp.ge.s32.totalorder %v83_v37, 838860  ;;  %vm86_vm1 = vcmp.ge.s32.totalorder %v84_v38, 838860 }
  0x2f   :  { %v87_v41 = vsel %vm85_vm0, 1.1111112, %v171_v40  ;;  %v88_v42 = vsel %vm86_vm1, 1.1111112, %v171_v40 }
  0x30   :  { %v91_v44 = vcombine.low %v87_v41, %v88_v42 }
  0x32   :  { %v98_v45 = vrot.slane %v91_v44, %v43_v31 }
  0x34   :  { %v100_v46 = vmul.f32 %v98_v45, %v46_v43 }
  0x36   :  { %101 = vst [vmem:[#allocation7] sm:$0xf] %v100_v46 }
  0x37   :  { %154 = shalt.err (!%p151_p12)
}
  0x38   :  { %s155_s4 = scalar_lea.hbm %s226_s3, 64 }
  0x39   :  { %p156_p13 = scmp.ne.s32.totalorder %s226_s3, %s155_s4  ;;  %p159_p0 = scmp.lt.u32.totalorder %s155_s4, %s226_s3 }
  0x3b   :  { %p161_p1 = pnand %p159_p0, %p156_p13 }
  0x3d   :  { %164 = shalt.err (!%p161_p1)
}
  0x3e   :  { %111 = dma.vmem_to_hbm [thread:$0]  %s109_s27, 64, %s226_s3, [#allocation6]  }
  0x3f   :  { %167 = dma.done.wait [#allocation6], 64  }
  0x40   :  { %168 = vsyncadd [#allocation6], 4294967232 }
  0x41   :  { %115 = vsyncpa [#allocation5], 1 }
  0x42   :  { %116 = vsyncpa [#allocation6], 1 }

</bundles_post_ra>
